<compile_context>
chip_gen: v6e
topology: v6e:2x2x1
jax: 0.10.0
libtpu: 0.0.40
codegen_flags: <defaults>
</compile_context>

<pallas_src>
import jax
import jax.numpy as jnp
from jax.experimental import pallas as pl
from jax.experimental.pallas import tpu as pltpu

# TODO(synk): the wrapped `self.model` is user-supplied in PyTorch; fixed here
# to a deterministic 2-layer tanh MLP so the full forward can be expressed.


def _ks1d_kernel(xmin_ref, xmax_ref, x_ref, w1_ref, b1_ref, w2_ref, b2_ref, o_ref):
    xmin = xmin_ref[0]
    xmax = xmax_ref[0]
    scale = xmax - xmin
    # One scalar reciprocal instead of a per-element divide.  x_max == x_min
    # gives inf, matching the PyTorch reference (documented precondition).
    inv_scale = 1.0 / scale

    x = x_ref[...]                                   # (tb, D) f32
    xn = (x - xmin) * inv_scale                      # data_to_input

    # bf16 MXU operands, f32 accumulation.  Inputs are normalized to [0,1]
    # so the precision loss is small (tolerance 5e-2 at the wrapper level).
    h = jnp.dot(xn.astype(jnp.bfloat16), w1_ref[...],
                preferred_element_type=jnp.float32) + b1_ref[...]
    # bf16 tanh: uses the bf16 EUP path on v6e/v7x and feeds the second MXU
    # matmul directly (no extra VALU cast).  Lowers to f32 EUP on v5e.
    h = jnp.tanh(h.astype(jnp.bfloat16))
    y = jnp.dot(h, w2_ref[...],
                preferred_element_type=jnp.float32) + b2_ref[...]

    o_ref[...] = y * scale + xmin                    # output_to_data


def ks1d_forward(x, x_min, x_max, w1, b1, w2, b2, *, tile_b=512):
    """Fused normalize -> MLP -> denormalize.  x: (B, D) or (D,) float32."""
    squeezed = x.ndim == 1
    if squeezed:
        x = x[None, :]
    B, D = x.shape
    H = w1.shape[1]
    assert D % 128 == 0 and H % 128 == 0, "spatial/hidden must be lane multiples"

    x = x.astype(jnp.float32)

    # Only pad when the batch is smaller than one sublane group (e.g. the
    # squeezed B=1 path): that pad moves < 4 KiB.  For all real batches the
    # partial last block is handled in-pipeline (no extra HBM pass).
    if B < 8:
        x = jnp.pad(x, ((0, 8 - B), (0, 0)))
        Bk = 8
    else:
        Bk = B

    # --- batch tile choice ---
    # (a) no larger than the (sublane-rounded) batch;
    # (b) clamped by a conservative VMEM budget: x/out double-buffered f32
    #     tiles + resident bf16 weights, sized against v7x's 64 MiB VMEM;
    # (c) capped so there are >= 2 grid steps when there is enough work, so
    #     dimension_semantics=("parallel",) can split the batch across v7x's
    #     two TensorCores (on v5e/v6e this just balances the two tiles).
    tb = min(int(tile_b), pl.cdiv(Bk, 8) * 8)
    weight_bytes = 2 * D * H * 2 + (H + D) * 4            # bf16 w1+w2, f32 biases
    io_bytes_per_row = 2 * 2 * D * 4                       # x + out, 2 bufs, f32
    vmem_rows = (32 * 1024 * 1024 - weight_bytes) // io_bytes_per_row
    tb = min(tb, vmem_rows)
    if Bk >= 16:
        tb = min(tb, pl.cdiv(pl.cdiv(Bk, 2), 8) * 8)
    tb = max(8, (tb // 8) * 8)
    grid_b = pl.cdiv(Bk, tb)

    xmin_arr = jnp.reshape(jnp.asarray(x_min, jnp.float32), (1,))
    xmax_arr = jnp.reshape(jnp.asarray(x_max, jnp.float32), (1,))
    w1_b = w1.astype(jnp.bfloat16)
    w2_b = w2.astype(jnp.bfloat16)
    b1_2d = b1.astype(jnp.float32).reshape(1, H)
    b2_2d = b2.astype(jnp.float32).reshape(1, D)

    # TODO(synk): if D/H are scaled up so the resident weights no longer fit
    # v7x's 64 MiB VMEM, tile the weights over a contraction grid axis
    # (f32 accumulator + pl.when init/finalize) instead of keeping them
    # resident.
    out = pl.pallas_call(
        _ks1d_kernel,
        out_shape=jax.ShapeDtypeStruct((Bk, D), jnp.float32),
        grid=(grid_b,),
        in_specs=[
            pl.BlockSpec(memory_space=pltpu.SMEM),             # x_min (scalar)
            pl.BlockSpec(memory_space=pltpu.SMEM),             # x_max (scalar)
            pl.BlockSpec((tb, D), lambda i: (i, 0)),           # x tile
            pl.BlockSpec((D, H), lambda i: (0, 0),
                         pipeline_mode=pl.Buffered(1)),        # w1 (resident)
            pl.BlockSpec((1, H), lambda i: (0, 0),
                         pipeline_mode=pl.Buffered(1)),        # b1
            pl.BlockSpec((H, D), lambda i: (0, 0),
                         pipeline_mode=pl.Buffered(1)),        # w2 (resident)
            pl.BlockSpec((1, D), lambda i: (0, 0),
                         pipeline_mode=pl.Buffered(1)),        # b2
        ],
        out_specs=pl.BlockSpec((tb, D), lambda i: (i, 0)),
        compiler_params=pltpu.CompilerParams(
            dimension_semantics=("parallel",),
        ),
    )(xmin_arr, xmax_arr, x, w1_b, b1_2d, w2_b, b2_2d)

    if Bk != B:
        out = out[:B]
    if squeezed:
        out = out[0]
    return out


def _reference_forward(x, x_min, x_max, w1, b1, w2, b2):
    scale = x_max - x_min
    xn = (x - x_min) / scale
    h = jnp.tanh(xn @ w1 + b1)
    y = h @ w2 + b2
    return y * scale + x_min


if __name__ == "__main__":
    key = jax.random.PRNGKey(0)
    kx, k1, k2, k3, k4 = jax.random.split(key, 5)

    # B not a multiple of the tile (exercises the masked partial last block
    # and the 2-step grid); H=256 fills the 256-wide MXU on v6e/v7x.
    B, D, H = 500, 128, 256
    X = jax.random.normal(kx, (B, D), jnp.float32)

    # Deterministic "model" parameters.
    W1 = 0.05 * jax.random.normal(k1, (D, H), jnp.float32)
    b1 = 0.01 * jax.random.normal(k2, (H,), jnp.float32)
    W2 = 0.05 * jax.random.normal(k3, (H, D), jnp.float32)
    b2 = 0.01 * jax.random.normal(k4, (D,), jnp.float32)

    # Statistics the wrapper would compute in .train(X, Y):
    mean = X.mean(axis=1)
    Xc = X - mean[:, None]
    X_min = Xc.min()
    X_max = Xc.max()

    Y = jax.block_until_ready(ks1d_forward(X, X_min, X_max, W1, b1, W2, b2))
    Y_ref = _reference_forward(X, X_min, X_max, W1, b1, W2, b2)
    assert Y.shape == (B, D)
    # Loose tolerance: kernel uses bf16 MXU operands / bf16 tanh with f32 accum.
    assert jnp.allclose(Y, Y_ref, atol=5e-2, rtol=5e-2), float(
        jnp.max(jnp.abs(Y - Y_ref)))

    # 1-D (squeezed) input path of the wrapper.
    y1 = jax.block_until_ready(ks1d_forward(X[0], X_min, X_max, W1, b1, W2, b2))
    assert y1.shape == (D,)
    assert jnp.allclose(y1, Y_ref[0], atol=5e-2, rtol=5e-2)

    print("KERNEL_OK")
</pallas_src>

<mosaic_0001>
module attributes {stable_mosaic.version = 11 : i64} {
  func.func @_ks1d_kernel(%arg0: i32, %arg1: memref<1xf32, #tpu.memory_space<smem>>, %arg2: memref<1xf32, #tpu.memory_space<smem>>, %arg3: memref<256x128xf32, #tpu.memory_space<vmem>>, %arg4: memref<128x256xbf16, #tpu.memory_space<vmem>>, %arg5: memref<1x256xf32, #tpu.memory_space<vmem>>, %arg6: memref<256x128xbf16, #tpu.memory_space<vmem>>, %arg7: memref<1x128xf32, #tpu.memory_space<vmem>>, %arg8: memref<256x128xf32, #tpu.memory_space<vmem>>) attributes {dimension_semantics = [#tpu.dimension_semantics<parallel>], iteration_bounds = array<i64: 2>, scalar_prefetch = 0 : i64, scratch_operands = 0 : i64, tpu.core_type = #tpu.core_type<tc>, window_params = [{transform_indices = @transform_0, window_bounds = array<i64: 1>}, {transform_indices = @transform_1, window_bounds = array<i64: 1>}, {transform_indices = @transform_2, window_bounds = array<i64: 256, 128>}, {pipeline_mode = #tpu.pipeline_mode<synchronous>, transform_indices = @transform_3, window_bounds = array<i64: 128, 256>}, {pipeline_mode = #tpu.pipeline_mode<synchronous>, transform_indices = @transform_4, window_bounds = array<i64: 1, 256>}, {pipeline_mode = #tpu.pipeline_mode<synchronous>, transform_indices = @transform_5, window_bounds = array<i64: 256, 128>}, {pipeline_mode = #tpu.pipeline_mode<synchronous>, transform_indices = @transform_6, window_bounds = array<i64: 1, 128>}, {transform_indices = @transform_7, window_bounds = array<i64: 256, 128>}]} {
    %c0 = arith.constant 0 : index
    %0 = memref.load %arg1[%c0] : memref<1xf32, #tpu.memory_space<smem>>
    %c0_0 = arith.constant 0 : index
    %1 = memref.load %arg2[%c0_0] : memref<1xf32, #tpu.memory_space<smem>>
    %2 = arith.subf %1, %0 : f32
    %cst = arith.constant 1.000000e+00 : f32
    %3 = arith.divf %cst, %2 : f32
    %c0_1 = arith.constant 0 : index
    %c0_2 = arith.constant 0 : index
    %4 = vector.load %arg3[%c0_1, %c0_2] : memref<256x128xf32, #tpu.memory_space<vmem>>, vector<256x128xf32>
    %5 = vector.broadcast %0 : f32 to vector<256x128xf32>
    %6 = arith.subf %4, %5 : vector<256x128xf32>
    %7 = vector.broadcast %3 : f32 to vector<256x128xf32>
    %8 = arith.mulf %6, %7 : vector<256x128xf32>
    %9 = arith.truncf %8 : vector<256x128xf32> to vector<256x128xbf16>
    %c0_3 = arith.constant 0 : index
    %c0_4 = arith.constant 0 : index
    %10 = vector.load %arg4[%c0_3, %c0_4] : memref<128x256xbf16, #tpu.memory_space<vmem>>, vector<128x256xbf16>
    %cst_5 = arith.constant dense<0.000000e+00> : vector<256x256xf32>
    %11 = tpu.matmul %9, %10, %cst_5 {dimension_numbers = #tpu.dot_dimension_numbers<[1], [0], [0], [1], [0, 0, 1, 1], [], []>} : vector<256x128xbf16>, vector<128x256xbf16>, vector<256x256xf32> -> vector<256x256xf32>
    %c0_6 = arith.constant 0 : index
    %c0_7 = arith.constant 0 : index
    %12 = vector.load %arg5[%c0_6, %c0_7] : memref<1x256xf32, #tpu.memory_space<vmem>>, vector<1x256xf32>
    %13 = vector.broadcast %12 : vector<1x256xf32> to vector<256x256xf32>
    %14 = arith.addf %11, %13 : vector<256x256xf32>
    %15 = arith.truncf %14 : vector<256x256xf32> to vector<256x256xbf16>
    %16 = math.tanh %15 : vector<256x256xbf16>
    %c0_8 = arith.constant 0 : index
    %c0_9 = arith.constant 0 : index
    %17 = vector.load %arg6[%c0_8, %c0_9] : memref<256x128xbf16, #tpu.memory_space<vmem>>, vector<256x128xbf16>
    %cst_10 = arith.constant dense<0.000000e+00> : vector<256x128xf32>
    %18 = tpu.matmul %16, %17, %cst_10 {dimension_numbers = #tpu.dot_dimension_numbers<[1], [0], [0], [1], [0, 0, 1, 1], [], []>} : vector<256x256xbf16>, vector<256x128xbf16>, vector<256x128xf32> -> vector<256x128xf32>
    %c0_11 = arith.constant 0 : index
    %c0_12 = arith.constant 0 : index
    %19 = vector.load %arg7[%c0_11, %c0_12] : memref<1x128xf32, #tpu.memory_space<vmem>>, vector<1x128xf32>
    %20 = vector.broadcast %19 : vector<1x128xf32> to vector<256x128xf32>
    %21 = arith.addf %18, %20 : vector<256x128xf32>
    %22 = vector.broadcast %2 : f32 to vector<256x128xf32>
    %23 = arith.mulf %21, %22 : vector<256x128xf32>
    %24 = vector.broadcast %0 : f32 to vector<256x128xf32>
    %25 = arith.addf %23, %24 : vector<256x128xf32>
    %c0_13 = arith.constant 0 : index
    %c0_14 = arith.constant 0 : index
    %26 = vector.load %arg8[%c0_13, %c0_14] : memref<256x128xf32, #tpu.memory_space<vmem>>, vector<256x128xf32>
    tpu.vector_store %arg8[%c0_13, %c0_14], %25 {strides = array<i32>} : memref<256x128xf32, #tpu.memory_space<vmem>>, vector<256x128xf32>,
    return
  }
  func.func @transform_0(%arg0: i32) -> i32 {
    %c0_i32 = arith.constant 0 : i32
    %c0_i32_0 = arith.constant 0 : i32
    return %c0_i32 : i32
  }
  func.func @transform_1(%arg0: i32) -> i32 {
    %c0_i32 = arith.constant 0 : i32
    %c0_i32_0 = arith.constant 0 : i32
    return %c0_i32 : i32
  }
  func.func @transform_2(%arg0: i32) -> (i32, i32) {
    %c0_i32 = arith.constant 0 : i32
    %c0_i32_0 = arith.constant 0 : i32
    return %arg0, %c0_i32 : i32, i32
  }
  func.func @transform_3(%arg0: i32) -> (i32, i32) {
    %c0_i32 = arith.constant 0 : i32
    %c0_i32_0 = arith.constant 0 : i32
    %c0_i32_1 = arith.constant 0 : i32
    return %c0_i32, %c0_i32_0 : i32, i32
  }
  func.func @transform_4(%arg0: i32) -> (i32, i32) {
    %c0_i32 = arith.constant 0 : i32
    %c0_i32_0 = arith.constant 0 : i32
    %c0_i32_1 = arith.constant 0 : i32
    return %c0_i32, %c0_i32_0 : i32, i32
  }
  func.func @transform_5(%arg0: i32) -> (i32, i32) {
    %c0_i32 = arith.constant 0 : i32
    %c0_i32_0 = arith.constant 0 : i32
    %c0_i32_1 = arith.constant 0 : i32
    return %c0_i32, %c0_i32_0 : i32, i32
  }
  func.func @transform_6(%arg0: i32) -> (i32, i32) {
    %c0_i32 = arith.constant 0 : i32
    %c0_i32_0 = arith.constant 0 : i32
    %c0_i32_1 = arith.constant 0 : i32
    return %c0_i32, %c0_i32_0 : i32, i32
  }
  func.func @transform_7(%arg0: i32) -> (i32, i32) {
    %c0_i32 = arith.constant 0 : i32
    %c0_i32_0 = arith.constant 0 : i32
    return %arg0, %c0_i32 : i32, i32
  }
}

</mosaic_0001>

<bundles_post_ra>
// kernel: tpu_custom_call.1
= control target key start
LH: loop header
LB: loop body
LE: loop exit
PB: predicated region body
PF: predicated region fallthrough
CT: control target
= control target key end

     0   :  { %s2440_s0 = inlined_call_operand.<no memory space> [shape: f32[1], index: 0, kind: input, shape index: {}]   ;;  %s2441_s1 = inlined_call_operand.<no memory space> [shape: f32[1], index: 1, kind: input, shape index: {}]   ;;  %s2442_s2 = inlined_call_operand.hbm [shape: f32[500,128], index: 2, kind: input, shape index: {}]   ;;  %s2443_s3 = inlined_call_operand.hbm [shape: bf16[128,256], index: 3, kind: input, shape index: {}]   ;;  %s2444_s4 = inlined_call_operand.vmem [shape: f32[1,256], index: 4, kind: input, shape index: {}]   ;;  %s2445_s5 = inlined_call_operand.hbm [shape: bf16[256,128], index: 5, kind: input, shape index: {}]   ;;  %s2446_s6 = inlined_call_operand.vmem [shape: f32[1,128], index: 6, kind: input, shape index: {}]   ;;  %s2447_s7 = inlined_call_operand.hbm [shape: f32[500,128], index: 7, kind: output, shape index: {}]  }
   0x1   :  { %12 = sst [smem:[#allocation2]] %s2440_s0 }
   0x2   :  { %13 = sst [smem:[#allocation3]] %s2441_s1 }
   0x3   :  { %14 = vsyncpa [#allocation5], 0 }
   0x4   :  { %16 = vsyncpa [#allocation5 + $0x1], 0 }
   0x5   :  { %17 = vsyncpa [#allocation8], 0 }
   0x6   :  { %18 = vsyncpa [#allocation6], 0 }
   0x7   :  { %20 = vsyncpa [#allocation6 + $0x1], 0  ;;  %s1892_s28 = smov 0   ;;  %s1894_s29 = smov 0  }
   0x8   :  { %s1896_s30 = smov 0   ;;  %s1898_s8 = smov 0  }
   0x9 LB: > { %s1913_s0 = sadd.s32 4294967295, %s1831_s8   ;;  %s1335_s1 = sadd.s32 4294967294, %s1831_s8   ;;  %s1831_s8 = sphi %s1898_s8, %s2464_s8   ;;  %s1827_s30 = sphi %s1896_s30, %s2463_s30   ;;  %s1823_s29 = sphi %s1894_s29, %s2462_s29   ;;  %s1819_s28 = sphi %s1892_s28, %s2461_s28  }
   0xa   : > { %s1917_s9 = sadd.s32 1, %s1831_s8   ;;  %s75_s10 = sadd.s32 1, %s1827_s30 }
   0xb   : > { %s72_s11 = ssub.s32 %s1831_s8, %s1917_s9  ;;  %p82_p0 = scmp.ne.s32.totalorder %s1827_s30, %s1823_s29 }
   0xc   : > { %p73_p1 = scmp.eq.s32.totalorder %s72_s11, 0  ;;  %p83_p2 = scmp.eq.s32.totalorder %s1831_s8, 0 }
   0xd   : > { %p88_p3 = scmp.ne.s32.totalorder %s1823_s29, %s1819_s28  ;;  %p2448_p4 = scmp.eq.s32.totalorder %s1913_s0, 0 }
   0xe   : > { %s1929_s12 = scalar_select %p73_p1, %s1827_s30, %s75_s10  }
   0xf   : > { %p1931_p5 = por %p83_p2, %p82_p0  ;;  %p1937_p6 = por %p2448_p4, %p88_p3 }
  0x10   : > { %p196_p7 = scmp.eq.s32.totalorder %s1913_s0, 1  ;;  %p202_p8 = scmp.eq.s32.totalorder %s1335_s1, 1 }
  0x11   : > { %s2451_s14 = scalar_select %p1937_p6, 1, 0 }
  0x12   : > { %p1336_p9 = scmp.ge.s32.totalorder %s1831_s8, 1  ;;  %p209_p10 = scmp.lt.s32.totalorder %s1831_s8, 3 }
  0x13   : > { %p1944_p11 = por %p196_p7, %p82_p0  ;;  %p1948_p12 = por %p202_p8, %p88_p3 }
  0x14   : > { %p1952_p13 = pnand %p1336_p9, %p209_p10  ;;  %s1833_s18 = smov [#allocation7]  }
  0x15   : > { %s2452_s15 = scalar_select %p1944_p11, 1, 0 }
  0x16   : > { %s2453_s16 = scalar_select %p1948_p12, 1, 0 }
  0x17   : > { %p1520_p1 = pneg %p1952_p13  ;;  %s227_s19 = sshll.u32 %s1833_s18, 4  ;;  %s228_s19 = int_to_ptr.vmem [resolvable:$true] %s227_s19 }
  0x18   : > { %s1834_s21 = smov [#allocation9]   ;;  %s1696_s23 = scalar_lea.vmem %s228_s19, 2048 }
  0x19   : > { %p1960_p2 = pnand %p1520_p1, %p2448_p4  ;;  %s243_s22 = sshll.u32 %s1834_s21, 4  ;;  %s244_s22 = int_to_ptr.vmem [resolvable:$true] %s243_s22 }
  0x1a   : > { %p1697_p3 = scmp.ne.s32.totalorder %s228_s19, %s1696_s23  ;;  %p1704_p9 = scmp.lt.s32.totalorder %s228_s19, %s228_s19 }
  0x1b   : > { %p1687_p0 = pneg %p1960_p2  ;;  %p1705_p10 = scmp.lt.s32.totalorder %s1696_s23, %s1696_s23 }
  0x1d   : > { %p1699_p7 = pnand %p1697_p3, %p1687_p0  ;;  %p1706_p12 = por %p1705_p10, %p1704_p9 }
  0x1f   : > { %p1700_p8 = pneg %p1699_p7 }
  0x21   : > { %p1707_p1 = pnand %p1706_p12, %p1700_p8 }
  0x23   : > { %1710 = shalt.err (!%p1707_p1)
}
  0x24   : > { %s1835_s24 = smov 128   ;;  %s1836_s25 = smov 8  }
  0x25   : > { %1523 = dma.hbm_to_vmem [thread:$0]  (!%p1960_p2), %s2443_s3, 2048, %s228_s19, [#allocation8], %s1835_s24, %s1835_s24, %s1836_s25  }
  0x26   : > { %s1722_s1 = scalar_lea.vmem %s244_s22, 2048  ;;  %p1730_p11 = scmp.lt.s32.totalorder %s244_s22, %s244_s22 }
  0x27   : > { %p1723_p4 = scmp.ne.s32.totalorder %s244_s22, %s1722_s1  ;;  %p1731_p6 = scmp.lt.s32.totalorder %s1722_s1, %s1722_s1 }
  0x29   : > { %p1725_p3 = pnand %p1723_p4, %p1687_p0  ;;  %p1732_p9 = por %p1731_p6, %p1730_p11 }
  0x2b   : > { %p1726_p7 = pneg %p1725_p3 }
  0x2d   : > { %p1733_p12 = pnand %p1732_p9, %p1726_p7 }
  0x2f   : > { %1736 = shalt.err (!%p1733_p12)
}
  0x30   : > { %s1837_s10 = smov 64   ;;  %s1838_s11 = smov 4  }
  0x31   : > { %1526 = dma.hbm_to_vmem [thread:$0]  (!%p1960_p2), %s2445_s5, 2048, %s244_s22, [#allocation8], %s1837_s10, %s1837_s10, %s1838_s11  }
  0x32   : > { %p1339_p8 = scmp.ge.s32.totalorder %s1831_s8, 2 }
  0x34   : > { %256 = sbr.rel (%p1339_p8) target bundleno = 89 (0x59), region = 40 }
  0x39   : > { %259 = sbr.rel (!%p1931_p5) target bundleno = 89 (0x59), region = 44  ;;  %s260_s19 = sand.u32 (%p1931_p5), 1, %s1827_s30  }
  0x3a   : > { %s1341_s23 = sshll.u32 (%p1931_p5), %s1831_s8, 5  ;;  %s1340_s24 = sshll.u32 (%p1931_p5), %s260_s19, 8 }
  0x3b   : > { %s266_s25 = ssub.s32 (%p1931_p5), 63, %s1341_s23  ;;  %s1992_s26 = scalar_lea.sflag (%p1931_p5), [#allocation5], %s260_s19 }
  0x3c   : > { %p267_p4 = scmp.lt.s32.totalorder (%p1931_p5), %s266_s25, 32  ;;  %s264_s27 = scalar_lea.vmem (%p1931_p5), [#allocation4], %s1340_s24 }
  0x3e   : > { %s2466_s25 = smov (!%p267_p4, %s266_s25), 32 }
  0x3f   : > { %s1989_s20 = sshll.u32 %s2466_s25, 7 }
  0x40   : > { %s271_s22 = ssub.s32 4096, %s1989_s20 }
  0x41   : > { %272 = vsyncadd %s1992_s26, %s271_s22  ;;  %p1343_p5 = scmp.ne.s32.totalorder %s1989_s20, 0  ;;  %s1394_s13 = sshll.u32 %s1831_s8, 12 }
  0x42   : > { %s2000_s11 = scalar_lea.hbm %s2442_s2, %s1394_s13  ;;  %s277_s18 = sshll.u32 %s264_s27, 4  ;;  %s2002_s18 = int_to_ptr.vmem [resolvable:$true] %s277_s18 }
  0x43   : > { %s1737_s21 = scalar_lea.hbm %s2000_s11, %s1989_s20  ;;  %s1741_s24 = scalar_lea.hbm %s2442_s2, 8064 }
  0x44   : > { %p1738_p6 = scmp.ne.s32.totalorder %s2000_s11, %s1737_s21  ;;  %p1742_p0 = scmp.lt.s32.totalorder %s2000_s11, %s2442_s2 }
  0x45   : > { %p1743_p10 = scmp.lt.s32.totalorder %s1741_s24, %s1737_s21 }
  0x46   : > { %p1739_p11 = pnand %p1738_p6, %p1343_p5 }
  0x47   : > { %p1744_p1 = por %p1743_p10, %p1742_p0 }
  0x48   : > { %p1740_p2 = pneg %p1739_p11 }
  0x4a   : > { %p1745_p3 = pnand %p1744_p1, %p1740_p2 }
  0x4c   : > { %1748 = shalt.err (!%p1745_p3)
}
  0x4d   : > { %s1749_s27 = scalar_lea.vmem %s2002_s18, %s1989_s20  ;;  %s1839_s13 = smov [#allocation4]  }
  0x4e   : > { %p1750_p7 = scmp.ne.s32.totalorder %s2002_s18, %s1749_s27  ;;  %s1753_s1 = sshll.u32 %s1839_s13, 4  ;;  %s1754_s1 = int_to_ptr.vmem [resolvable:$false] %s1753_s1 }
  0x4f   : > { %s1755_s10 = scalar_lea.vmem %s1754_s1, 8192  ;;  %p1756_p4 = scmp.lt.s32.totalorder %s2002_s18, %s1754_s1 }
  0x50   : > { %p1751_p9 = pnand %p1750_p7, %p1343_p5  ;;  %p1757_p6 = scmp.lt.s32.totalorder %s1755_s10, %s1749_s27 }
  0x52   : > { %p1752_p12 = pneg %p1751_p9  ;;  %p1758_p11 = por %p1757_p6, %p1756_p4 }
  0x54   : > { %p1759_p0 = pnand %p1758_p11, %p1752_p12 }
  0x56   : > { %1762 = shalt.err (!%p1759_p0)
}
  0x57   : > { %s1840_s21 = smov 128   ;;  %s1841_s19 = smov 8  }
  0x58   : > { %283 = dma.hbm_to_vmem [thread:$0]  (%p1343_p5), %s2000_s11, %s1989_s20, %s2002_s18, %s1992_s26, %s1840_s21, %s1840_s21, %s1841_s19  }
  0x59 PF: > { %289 = sbr.rel (%p1952_p13) target bundleno = 751 (0x2ef), region = 48  ;;  %s2031_s23 = sand.u32 (!%p1952_p13), 1, %s1823_s29  }
  0x5a   : > { %s1348_s24 = sshll.u32 (!%p1952_p13), %s2031_s23, 8  ;;  %s292_s25 = scalar_lea.sflag (!%p1952_p13), [#allocation5], %s2031_s23 }
  0x5b   : > { %s2037_s22 = scalar_lea.vmem (!%p1952_p13), [#allocation4], %s1348_s24  ;;  %p2456_p2 = scmp.ne.s32.totalorder (!%p1952_p13), %s2451_s14, 0 }
  0x5e   : > { %1806 = dma.done.wait (%p2456_p2), %s292_s25, 4096  }
  0x5f   : > { %1808 = vsyncadd (%p2456_p2), %s292_s25, 4294963200  ;;  %p2457_p5 = scmp.eq.s32.totalorder %s1913_s0, 0 }
  0x61   : > { %1810 = dma.done.wait (%p2457_p5), [#allocation8], 4096   ;;  %p2458_p13 = pmov %p2457_p5 }
  0x62   : > { %s2047_s17 = sld [smem:[#allocation2]]  ;;  %v1842_v0 = vmov 0   ;;  %v1579_v1 = vld [vmem:[#allocation7 + $0x74] ss:$8 sps:$4 sm:$0xff]   ;;  %v1581_v2 = vld [vmem:[#allocation7 + $0x70] ss:$8 sps:$4 sm:$0xff]  }
  0x63   : > { %1812 = vsyncadd (%p2458_p13), [#allocation8], 4294963200  ;;  %605 = vmatprep.mubr.bf16.mxu0 %v1842_v0  ;;  %s346_s20 = sld [smem:[#allocation3]]  ;;  %573 = vmatprep.subr.bf16.mxu0 %v1579_v1  ;;  %v1582_v3 = vld [vmem:[#allocation7 + $0x64] ss:$8 sps:$4 sm:$0xff]   ;;  %v1603_v24 = vld [vmem:[#allocation9 + $0x78] sm:$0xff]  }
  0x64   : > { %574 = vmatpush1.bf16.msra.mxu0 %v1581_v2  ;;  %v1584_v5 = vld [vmem:[#allocation7 + $0x60] ss:$8 sps:$4 sm:$0xff]   ;;  %v1585_v6 = vld [vmem:[#allocation7 + $0x54] ss:$8 sps:$4 sm:$0xff]   ;;  %v1587_v7 = vld [vmem:[#allocation7 + $0x50] ss:$8 sps:$4 sm:$0xff]   ;;  %1396 = vmatprep.subr.bf16.mxu1 %v1603_v24 }
  0x65   : > { %575 = vmatprep.subr.bf16.mxu0 %v1582_v3  ;;  %v1588_v8 = vld [vmem:[#allocation7 + $0x44] ss:$8 sps:$4 sm:$0xff]   ;;  %v1590_v9 = vld [vmem:[#allocation7 + $0x40] ss:$8 sps:$4 sm:$0xff]   ;;  %v1591_v10 = vld [vmem:[#allocation7 + $0x34] ss:$8 sps:$4 sm:$0xff]  }
  0x66   : > { %v1593_v11 = vld [vmem:[#allocation7 + $0x30] ss:$8 sps:$4 sm:$0xff]   ;;  %v1594_v12 = vld [vmem:[#allocation7 + $0x24] ss:$8 sps:$4 sm:$0xff]   ;;  %v1596_v14 = vld [vmem:[#allocation7 + $0x20] ss:$8 sps:$4 sm:$0xff]  }
  0x67   : > { %v1597_v15 = vld [vmem:[#allocation7 + $0x14] ss:$8 sps:$4 sm:$0xff]   ;;  %v1599_v16 = vld [vmem:[#allocation7 + $0x10] ss:$8 sps:$4 sm:$0xff]   ;;  %v1600_v17 = vld [vmem:[#allocation7 + $0x4] ss:$8 sps:$4 sm:$0xff]  }
  0x68   : > { %576 = vmatpush1.bf16.msra.mxu0 %v1584_v5  ;;  %v1602_v18 = vld [vmem:[#allocation7] ss:$8 sps:$4 sm:$0xff]   ;;  %v2055_v19 = vstv %s2047_s17  ;;  %v1604_v25 = vld [vmem:[#allocation9 + $0x38] sm:$0xff]   ;;  %v1605_v26 = vld [vmem:[#allocation9 + $0x70] sm:$0xff]   ;;  %s2252_s1 = scalar_lea.vmem [#allocation10], %s1348_s24  ;;  %s1224_s10 = scalar_lea.sflag [#allocation6], %s2031_s23 }
  0x69   : > { %s347_s26 = ssub.f32 %s346_s20, %s2047_s17  ;;  %577 = vmatprep.subr.bf16.mxu0 %v1585_v6  ;;  %v351_v20 = vld [vmem:[%s2037_s22] sm:$0xff]  ;;  %v352_v21 = vld [vmem:[%s2037_s22 + $0x8] sm:$0xff]  ;;  %v353_v28 = vld [vmem:[%s2037_s22 + $0x10] sm:$0xff]  ;;  %1397 = vmatpush3.bf16.msra.mxu1 %v1604_v25  ;;  %p2459_p10 = scmp.ne.s32.totalorder %s2452_s15, 0 }
  0x6a   : > { %v384_v22 = vsub.f32 %v351_v20, %v2055_v19  ;;  %v385_v23 = vsub.f32 %v352_v21, %v2055_v19  ;;  %v354_v29 = vld [vmem:[%s2037_s22 + $0x18] sm:$0xff]  ;;  %1398 = vmatprep.subr.bf16.mxu1 %v1605_v26  ;;  %v386_v33 = vsub.f32 %v353_v28, %v2055_v19  ;;  %v355_v37 = vld [vmem:[%s2037_s22 + $0x20] sm:$0xff]  ;;  %v356_v38 = vld [vmem:[%s2037_s22 + $0x28] sm:$0xff]  ;;  %s1386_s21 = sshll.u32 (%p2459_p10), %s1913_s0, 5 }
  0x6b   : > { %v2051_v4 = vstv %s347_s26  ;;  %v387_v34 = vsub.f32 %v354_v29, %v2055_v19  ;;  %v388_v40 = vsub.f32 %v355_v37, %v2055_v19  ;;  %v389_v41 = vsub.f32 %v356_v38, %v2055_v19  ;;  %v357_v44 = vld [vmem:[%s2037_s22 + $0x30] sm:$0xff]  ;;  %v358_v45 = vld [vmem:[%s2037_s22 + $0x38] sm:$0xff]  ;;  %v359_v51 = vld [vmem:[%s2037_s22 + $0x40] sm:$0xff]  ;;  %s1232_s19 = ssub.s32 (%p2459_p10), 63, %s1386_s21 }
  0x6c   : > { %1619 = vrcp.f32 %v2051_v4  ;;  %578 = vmatpush1.bf16.msra.mxu0 %v1587_v7  ;;  %v390_v47 = vsub.f32 %v357_v44, %v2055_v19  ;;  %v391_v48 = vsub.f32 %v358_v45, %v2055_v19  ;;  %v360_v52 = vld [vmem:[%s2037_s22 + $0x48] sm:$0xff]  ;;  %v392_v54 = vsub.f32 %v359_v51, %v2055_v19  ;;  %v361_v58 = vld [vmem:[%s2037_s22 + $0x50] sm:$0xff]  ;;  %v362_v59 = vld [vmem:[%s2037_s22 + $0x58] sm:$0xff]  ;;  %p1233_p1 = scmp.lt.s32.totalorder (%p2459_p10), %s1232_s19, 32 }
  0x6d   : > { %579 = vmatprep.subr.bf16.mxu0 %v1588_v8  ;;  %v393_v55 = vsub.f32 %v360_v52, %v2055_v19  ;;  %v394_v61 = vsub.f32 %v361_v58, %v2055_v19  ;;  %v395_v62 = vsub.f32 %v362_v59, %v2055_v19  ;;  %v363_v2 = vld [vmem:[%s2037_s22 + $0x60] sm:$0xff]  ;;  %v364_v3 = vld [vmem:[%s2037_s22 + $0x68] sm:$0xff]  ;;  %v369_v25 = vld [vmem:[%s2037_s22 + $0x90] sm:$0xff] }
  0x6e   : > { %v396_v6 = vsub.f32 %v363_v2, %v2055_v19  ;;  %v397_v7 = vsub.f32 %v364_v3, %v2055_v19  ;;  %v370_v26 = vld [vmem:[%s2037_s22 + $0x98] sm:$0xff]  ;;  %v402_v29 = vsub.f32 %v369_v25, %v2055_v19  ;;  %v1609_v45 = vld [vmem:[#allocation9 + $0x60] sm:$0xff]   ;;  %v1615_v58 = vld [vmem:[#allocation9 + $0x48] sm:$0xff]  }
  0x6f   : > { %v374_v44 = vld [vmem:[%s2037_s22 + $0xb8] sm:$0xff]  ;;  %v377_v2 = vld [vmem:[%s2037_s22 + $0xd0] sm:$0xff] }
  0x70   : > { %580 = vmatpush1.bf16.msra.mxu0 %v1590_v9  ;;  %v1612_v51 = vld [vmem:[#allocation9 + $0x18] sm:$0xff]  }
  0x71   : > { %581 = vmatprep.subr.bf16.mxu0 %v1591_v10  ;;  %v365_v10 = vld [vmem:[%s2037_s22 + $0x70] sm:$0xff]  ;;  %v378_v3 = vld [vmem:[%s2037_s22 + $0xd8] sm:$0xff] }
  0x74   : > { %582 = vmatpush1.bf16.msra.mxu0 %v1593_v11  ;;  %v366_v11 = vld [vmem:[%s2037_s22 + $0x78] sm:$0xff] }
  0x75   : > { %583 = vmatprep.subr.bf16.mxu0 %v1594_v12 }
  0x78   : > { %584 = vmatpush1.bf16.msra.mxu0 %v1596_v14  ;;  %v399_v14 = vsub.f32 %v366_v11, %v2055_v19 }
  0x79   : > { %v1620_v13 = vpop.eup %1619  ;;  %585 = vmatprep.subr.bf16.mxu0 %v1597_v15 }
  0x7a   : > { %1508 = vpush %v1620_v13  ;;  %v398_v13 = vsub.f32 %v365_v10, %v2055_v19 }
  0x7c   : > { %586 = vmatpush1.bf16.msra.mxu0 %v1599_v16 }
  0x7d   : > { %587 = vmatprep.subr.bf16.mxu0 %v1600_v17  ;;  %v367_v17 = vld [vmem:[%s2037_s22 + $0x80] sm:$0xff] }
  0x7e   : > { %v400_v21 = vsub.f32 %v367_v17, %v2055_v19 }
  0x80   : > { %588 = vmatpush1.bf16.msra.mxu0 %v1602_v18  ;;  %v368_v18 = vld [vmem:[%s2037_s22 + $0x88] sm:$0xff] }
  0xab   : > { %s1509_s14 = spop %1508 }
  0xac   : > { %v2061_v27 = vstv %s1509_s14 }
  0xad   : > { %v417_v30 = vmul.f32 %v2061_v27, %v384_v22  ;;  %v418_v31 = vmul.f32 %v2061_v27, %v385_v23  ;;  %v419_v35 = vmul.f32 %v2061_v27, %v386_v33  ;;  %v420_v36 = vmul.f32 %v2061_v27, %v387_v34  ;;  %v371_v34 = vld [vmem:[%s2037_s22 + $0xa0] sm:$0xff] }
  0xae   : > { %v421_v42 = vmul.f32 %v2061_v27, %v388_v40  ;;  %v422_v43 = vmul.f32 %v2061_v27, %v389_v41  ;;  %v423_v49 = vmul.f32 %v2061_v27, %v390_v47  ;;  %v424_v50 = vmul.f32 %v2061_v27, %v391_v48  ;;  %v1608_v40 = vld [vmem:[#allocation9 + $0x28] sm:$0xff]   ;;  %v1611_v47 = vld [vmem:[#allocation9 + $0x58] sm:$0xff]  }
  0xaf   : > { %v449_v32 = vpack.c.bf16 %v418_v31, %v417_v30  ;;  %v450_v39 = vpack.c.bf16 %v420_v36, %v419_v35  ;;  %v425_v56 = vmul.f32 %v2061_v27, %v392_v54  ;;  %v426_v57 = vmul.f32 %v2061_v27, %v393_v55  ;;  %v1606_v31 = vld [vmem:[#allocation9 + $0x30] sm:$0xff]   ;;  %v372_v35 = vld [vmem:[%s2037_s22 + $0xa8] sm:$0xff]  ;;  %v375_v54 = vld [vmem:[%s2037_s22 + $0xc0] sm:$0xff] }
  0xb0   : > { %v451_v46 = vpack.c.bf16 %v422_v43, %v421_v42  ;;  %v452_v53 = vpack.c.bf16 %v424_v50, %v423_v49  ;;  %v427_v63 = vmul.f32 %v2061_v27, %v394_v61  ;;  %v428_v1 = vmul.f32 %v2061_v27, %v395_v62  ;;  %1399 = vmatpush3.bf16.msra.mxu1 %v1606_v31  ;;  %v1607_v36 = vld [vmem:[#allocation9 + $0x68] sm:$0xff]   ;;  %v373_v43 = vld [vmem:[%s2037_s22 + $0xb0] sm:$0xff] }
  0xb1   : > { %606 = vmatmul.mubr.bf16.vlgmr.msra.gmra.mxu0 %v449_v32  ;;  %v453_v60 = vpack.c.bf16 %v426_v57, %v425_v56  ;;  %v429_v8 = vmul.f32 %v2061_v27, %v396_v6  ;;  %v430_v9 = vmul.f32 %v2061_v27, %v397_v7  ;;  %v431_v15 = vmul.f32 %v2061_v27, %v398_v13  ;;  %v376_v55 = vld [vmem:[%s2037_s22 + $0xc8] sm:$0xff]  ;;  %v1613_v56 = vld [vmem:[#allocation9 + $0x50] sm:$0xff]   ;;  %v1618_v6 = vld [vmem:[#allocation9] sm:$0xff]  }
  0xb2   : > { %615 = vmatprep.mubr.bf16.mxu0 %v1842_v0  ;;  %v454_v5 = vpack.c.bf16 %v428_v1, %v427_v63  ;;  %v432_v16 = vmul.f32 %v2061_v27, %v399_v14  ;;  %v401_v22 = vsub.f32 %v368_v18, %v2055_v19  ;;  %v433_v23 = vmul.f32 %v2061_v27, %v400_v21  ;;  %v1614_v57 = vld [vmem:[#allocation9 + $0x10] sm:$0xff]   ;;  %v1616_v62 = vld [vmem:[#allocation9 + $0x8] sm:$0xff]   ;;  %v382_v21 = vld [vmem:[%s2037_s22 + $0xf8] sm:$0xff] }
  0xb3   : > { %v455_v12 = vpack.c.bf16 %v430_v9, %v429_v8  ;;  %v403_v30 = vsub.f32 %v370_v26, %v2055_v19  ;;  %v435_v32 = vmul.f32 %v2061_v27, %v402_v29  ;;  %1400 = vmatprep.subr.bf16.mxu1 %v1607_v36  ;;  %v404_v38 = vsub.f32 %v371_v34, %v2055_v19  ;;  %v380_v13 = vld [vmem:[%s2037_s22 + $0xe8] sm:$0xff] }
  0xb4   : > { %v456_v20 = vpack.c.bf16 %v432_v16, %v431_v15  ;;  %v434_v24 = vmul.f32 %v2061_v27, %v401_v22  ;;  %1401 = vmatpush3.bf16.msra.mxu1 %v1608_v40  ;;  %v406_v49 = vsub.f32 %v373_v43, %v2055_v19  ;;  %v407_v50 = vsub.f32 %v374_v44, %v2055_v19 }
  0xb5   : > { %v436_v33 = vmul.f32 %v2061_v27, %v403_v30  ;;  %v437_v41 = vmul.f32 %v2061_v27, %v404_v38  ;;  %1402 = vmatprep.subr.bf16.mxu1 %v1609_v45  ;;  %v409_v61 = vsub.f32 %v376_v55, %v2055_v19  ;;  %v410_v8 = vsub.f32 %v377_v2, %v2055_v19 }
  0xb6   : > { %v457_v28 = vpack.c.bf16 %v434_v24, %v433_v23  ;;  %v439_v52 = vmul.f32 %v2061_v27, %v406_v49  ;;  %v411_v9 = vsub.f32 %v378_v3, %v2055_v19  ;;  %v413_v16 = vsub.f32 %v380_v13, %v2055_v19 }
  0xb7   : > { %v458_v37 = vpack.c.bf16 %v436_v33, %v435_v32  ;;  %v442_v1 = vmul.f32 %v2061_v27, %v409_v61  ;;  %v443_v10 = vmul.f32 %v2061_v27, %v410_v8  ;;  %v415_v24 = vsub.f32 %v382_v21, %v2055_v19  ;;  %v481_v32 = vld [vmem:[%s2444_s4] sm:$0x3] }
  0xb8   : > { %v444_v11 = vmul.f32 %v2061_v27, %v411_v9  ;;  %v446_v18 = vmul.f32 %v2061_v27, %v413_v16  ;;  %v483_v29 = vlaneseq }
  0xb9   : > { %616 = vmatmul.mubr.bf16.gmra.mxu0 %v450_v39  ;;  %v405_v39 = vsub.f32 %v372_v35, %v2055_v19  ;;  %v448_v26 = vmul.f32 %v2061_v27, %v415_v24 }
  0xba   : > { %625 = vmatprep.mubr.bf16.mxu0 %v1842_v0  ;;  %v462_v14 = vpack.c.bf16 %v444_v11, %v443_v10  ;;  %v484_v30 = vshrl.u32 %v483_v29, 7 }
  0xbb   : > { %v438_v42 = vmul.f32 %v2061_v27, %v405_v39 }
  0xbc   : > { %v485_v31 = vsub.s32 0, %v484_v30  ;;  %v489_v33 = vsub.s32 1, %v484_v30 }
  0xbd   : > { %v459_v48 = vpack.c.bf16 %v438_v42, %v437_v41 }
  0xbe   : > { %v2173_v35 = vrot.slane %v481_v32, %v485_v31 }
  0xc1   : > { %626 = vmatmul.mubr.bf16.gmra.mxu0 %v451_v46  ;;  %v1610_v46 = vld [vmem:[#allocation9 + $0x20] sm:$0xff]  }
  0xc2   : > { %635 = vmatprep.mubr.bf16.mxu0 %v1842_v0  ;;  %1403 = vmatpush3.bf16.msra.mxu1 %v1610_v46 }
  0xc3   : > { %1404 = vmatprep.subr.bf16.mxu1 %v1611_v47 }
  0xc6   : > { %1405 = vmatpush3.bf16.msra.mxu1 %v1612_v51 }
  0xc7   : > { %1406 = vmatprep.subr.bf16.mxu1 %v1613_v56 }
  0xc9   : > { %636 = vmatmul.mubr.bf16.gmra.mxu0 %v452_v53  ;;  %v440_v53 = vmul.f32 %v2061_v27, %v407_v50 }
  0xca   : > { %645 = vmatprep.mubr.bf16.mxu0 %v1842_v0  ;;  %1407 = vmatpush3.bf16.msra.mxu1 %v1614_v57 }
  0xcb   : > { %v460_v59 = vpack.c.bf16 %v440_v53, %v439_v52  ;;  %1408 = vmatprep.subr.bf16.mxu1 %v1615_v58 }
  0xce   : > { %1409 = vmatpush3.bf16.msra.mxu1 %v1616_v62 }
  0xd1   : > { %646 = vmatmul.mubr.bf16.gmra.mxu0 %v453_v60  ;;  %v408_v60 = vsub.f32 %v375_v54, %v2055_v19 }
  0xd2   : > { %655 = vmatprep.mubr.bf16.mxu0 %v1842_v0 }
  0xd3   : > { %v441_v63 = vmul.f32 %v2061_v27, %v408_v60 }
  0xd5   : > { %v461_v7 = vpack.c.bf16 %v442_v1, %v441_v63 }
  0xd9   : > { %656 = vmatmul.mubr.bf16.gmra.mxu0 %v454_v5  ;;  %v1617_v5 = vld [vmem:[#allocation9 + $0x40] sm:$0xff]  }
  0xda   : > { %665 = vmatprep.mubr.bf16.mxu0 %v1842_v0  ;;  %1410 = vmatprep.subr.bf16.mxu1 %v1617_v5 }
  0xdb   : > { %1411 = vmatpush3.bf16.msra.mxu1 %v1618_v6 }
  0xe1   : > { %666 = vmatmul.mubr.bf16.gmra.mxu0 %v455_v12  ;;  %v379_v12 = vld [vmem:[%s2037_s22 + $0xe0] sm:$0xff] }
  0xe2   : > { %675 = vmatprep.mubr.bf16.mxu0 %v1842_v0  ;;  %v412_v15 = vsub.f32 %v379_v12, %v2055_v19 }
  0xe4   : > { %v445_v17 = vmul.f32 %v2061_v27, %v412_v15 }
  0xe6   : > { %v463_v22 = vpack.c.bf16 %v446_v18, %v445_v17 }
  0xe9   : > { %676 = vmatmul.mubr.bf16.gmra.mxu0 %v456_v20  ;;  %v381_v20 = vld [vmem:[%s2037_s22 + $0xf0] sm:$0xff] }
  0xea   : > { %685 = vmatprep.mubr.bf16.mxu0 %v1842_v0  ;;  %v414_v23 = vsub.f32 %v381_v20, %v2055_v19 }
  0xec   : > { %v447_v25 = vmul.f32 %v2061_v27, %v414_v23 }
  0xf1   : > { %686 = vmatmul.mubr.bf16.gmra.mxu0 %v457_v28  ;;  %v464_v28 = vpack.c.bf16 %v448_v26, %v447_v25 }
  0xf2   : > { %695 = vmatprep.mubr.bf16.mxu0 %v1842_v0 }
  0xf9   : > { %696 = vmatmul.mubr.bf16.gmra.mxu0 %v458_v37  ;;  %v2175_v37 = vrot.slane %v481_v32, %v489_v33 }
  0xfa   : > { %705 = vmatprep.mubr.bf16.mxu0 %v1842_v0 }
 0x101   : > { %706 = vmatmul.mubr.bf16.gmra.mxu0 %v459_v48 }
 0x102   : > { %715 = vmatprep.mubr.bf16.mxu0 %v1842_v0 }
 0x109   : > { %716 = vmatmul.mubr.bf16.gmra.mxu0 %v460_v59 }
 0x10a   : > { %725 = vmatprep.mubr.bf16.mxu0 %v1842_v0 }
 0x111   : > { %726 = vmatmul.mubr.bf16.gmra.mxu0 %v461_v7 }
 0x112   : > { %735 = vmatprep.mubr.bf16.mxu0 %v1842_v0 }
 0x119   : > { %736 = vmatmul.mubr.bf16.gmra.mxu0 %v462_v14 }
 0x11a   : > { %745 = vmatprep.mubr.bf16.mxu0 %v1842_v0 }
 0x121   : > { %746 = vmatmul.mubr.bf16.gmra.mxu0 %v463_v22 }
 0x122   : > { %755 = vmatprep.mubr.bf16.mxu0 %v1842_v0 }
 0x129   : > { %756 = vmatmul.mubr.bf16.gmra.mxu0 %v464_v28 }
 0x171   : > { %v607_v34 = vpop.f32.mrf.mxu0 }
 0x172   : > { %v608_v27 = vadd.f32 %v607_v34, %v2173_v35 }
 0x173   : > { %v609_v36 = vpop.f32.mrf.mxu0 }
 0x174   : > { %v610_v40 = vadd.f32 %v609_v36, %v2175_v37 }
 0x175   : > { %v611_v0 = vpop.f32.mrf.mxu0 }
 0x176   : > { %v612_v38 = vadd.f32 %v611_v0, %v2173_v35 }
 0x177   : > { %v613_v39 = vpop.f32.mrf.mxu0 }
 0x178   : > { %v614_v41 = vadd.f32 %v613_v39, %v2175_v37  ;;  %v766_v42 = vpack.c.bf16 %v612_v38, %v608_v27 }
 0x179   : > { %v617_v43 = vpop.f32.mrf.mxu0 }
 0x17a   : > { %v767_v44 = vpack.c.bf16 %v614_v41, %v610_v40  ;;  %v618_v48 = vadd.f32 %v617_v43, %v2173_v35 }
 0x17b   : > { %v619_v45 = vpop.f32.mrf.mxu0 }
 0x17c   : > { %1621 = vtanh.bf16 %v767_v44  ;;  %v620_v50 = vadd.f32 %v619_v45, %v2175_v37 }
 0x17d   : > { %1623 = vtanh.bf16 %v766_v42  ;;  %v621_v46 = vpop.f32.mrf.mxu0 }
 0x17e   : > { %v622_v47 = vadd.f32 %v621_v46, %v2173_v35 }
 0x17f   : > { %v623_v49 = vpop.f32.mrf.mxu0 }
 0x180   : > { %v624_v51 = vadd.f32 %v623_v49, %v2175_v37  ;;  %v768_v52 = vpack.c.bf16 %v622_v47, %v618_v48 }
 0x181   : > { %v627_v53 = vpop.f32.mrf.mxu0 }
 0x182   : > { %v769_v54 = vpack.c.bf16 %v624_v51, %v620_v50  ;;  %v628_v58 = vadd.f32 %v627_v53, %v2173_v35 }
 0x183   : > { %v629_v55 = vpop.f32.mrf.mxu0 }
 0x184   : > { %1625 = vtanh.bf16 %v769_v54  ;;  %v630_v60 = vadd.f32 %v629_v55, %v2175_v37 }
 0x185   : > { %1627 = vtanh.bf16 %v768_v52  ;;  %v631_v56 = vpop.f32.mrf.mxu0 }
 0x186   : > { %v632_v57 = vadd.f32 %v631_v56, %v2173_v35 }
 0x187   : > { %v633_v59 = vpop.f32.mrf.mxu0 }
 0x188   : > { %v634_v61 = vadd.f32 %v633_v59, %v2175_v37  ;;  %v770_v62 = vpack.c.bf16 %v632_v57, %v628_v58 }
 0x189   : > { %v637_v63 = vpop.f32.mrf.mxu0 }
 0x18a   : > { %v1622_v1 = vpop.eup %1621  ;;  %v771_v2 = vpack.c.bf16 %v634_v61, %v630_v60  ;;  %v638_v8 = vadd.f32 %v637_v63, %v2173_v35 }
 0x18b   : > { %v1624_v3 = vpop.eup %1623  ;;  %v639_v5 = vpop.f32.mrf.mxu0  ;;  %997 = vmatprep.mubr.bf16.mxu1 %v1622_v1 }
 0x18c   : > { %1629 = vtanh.bf16 %v771_v2  ;;  %998 = vmatmul.mubr.bf16.vlgmr.msra.gmra.mxu1 %v1624_v3  ;;  %v640_v10 = vadd.f32 %v639_v5, %v2175_v37 }
 0x18d   : > { %1631 = vtanh.bf16 %v770_v62  ;;  %v641_v6 = vpop.f32.mrf.mxu0 }
 0x18e   : > { %v642_v7 = vadd.f32 %v641_v6, %v2173_v35 }
 0x18f   : > { %v643_v9 = vpop.f32.mrf.mxu0 }
 0x190   : > { %v644_v11 = vadd.f32 %v643_v9, %v2175_v37  ;;  %v772_v12 = vpack.c.bf16 %v642_v7, %v638_v8 }
 0x191   : > { %v647_v13 = vpop.f32.mrf.mxu0 }
 0x192   : > { %v1626_v14 = vpop.eup %1625  ;;  %v773_v15 = vpack.c.bf16 %v644_v11, %v640_v10  ;;  %v648_v21 = vadd.f32 %v647_v13, %v2173_v35 }
 0x193   : > { %v1628_v16 = vpop.eup %1627  ;;  %v649_v17 = vpop.f32.mrf.mxu0  ;;  %1005 = vmatprep.mubr.bf16.mxu1 %v1626_v14 }
 0x194   : > { %1633 = vtanh.bf16 %v773_v15  ;;  %1006 = vmatmul.mubr.bf16.gmra.mxu1 %v1628_v16  ;;  %v650_v23 = vadd.f32 %v649_v17, %v2175_v37 }
 0x195   : > { %1635 = vtanh.bf16 %v772_v12  ;;  %v651_v18 = vpop.f32.mrf.mxu0 }
 0x196   : > { %v652_v20 = vadd.f32 %v651_v18, %v2173_v35 }
 0x197   : > { %v653_v22 = vpop.f32.mrf.mxu0 }
 0x198   : > { %v654_v24 = vadd.f32 %v653_v22, %v2175_v37  ;;  %v774_v25 = vpack.c.bf16 %v652_v20, %v648_v21 }
 0x199   : > { %v657_v26 = vpop.f32.mrf.mxu0 }
 0x19a   : > { %v1630_v28 = vpop.eup %1629  ;;  %v775_v29 = vpack.c.bf16 %v654_v24, %v650_v23  ;;  %v658_v34 = vadd.f32 %v657_v26, %v2173_v35 }
 0x19b   : > { %v1632_v30 = vpop.eup %1631  ;;  %v659_v31 = vpop.f32.mrf.mxu0  ;;  %1013 = vmatprep.mubr.bf16.mxu1 %v1630_v28 }
 0x19c   : > { %1637 = vtanh.bf16 %v775_v29  ;;  %1014 = vmatmul.mubr.bf16.gmra.mxu1 %v1632_v30  ;;  %v660_v0 = vadd.f32 %v659_v31, %v2175_v37 }
 0x19d   : > { %1639 = vtanh.bf16 %v774_v25  ;;  %v661_v32 = vpop.f32.mrf.mxu0 }
 0x19e   : > { %v662_v33 = vadd.f32 %v661_v32, %v2173_v35 }
 0x19f   : > { %v663_v36 = vpop.f32.mrf.mxu0 }
 0x1a0   : > { %v664_v38 = vadd.f32 %v663_v36, %v2175_v37  ;;  %v776_v27 = vpack.c.bf16 %v662_v33, %v658_v34 }
 0x1a1   : > { %v667_v39 = vpop.f32.mrf.mxu0 }
 0x1a2   : > { %v1634_v40 = vpop.eup %1633  ;;  %v777_v41 = vpack.c.bf16 %v664_v38, %v660_v0  ;;  %v668_v46 = vadd.f32 %v667_v39, %v2173_v35 }
 0x1a3   : > { %v1636_v42 = vpop.eup %1635  ;;  %v669_v43 = vpop.f32.mrf.mxu0  ;;  %1021 = vmatprep.mubr.bf16.mxu1 %v1634_v40 }
 0x1a4   : > { %1641 = vtanh.bf16 %v777_v41  ;;  %1022 = vmatmul.mubr.bf16.gmra.mxu1 %v1636_v42  ;;  %v670_v48 = vadd.f32 %v669_v43, %v2175_v37 }
 0x1a5   : > { %1643 = vtanh.bf16 %v776_v27  ;;  %v671_v44 = vpop.f32.mrf.mxu0 }
 0x1a6   : > { %v672_v45 = vadd.f32 %v671_v44, %v2173_v35 }
 0x1a7   : > { %v673_v47 = vpop.f32.mrf.mxu0 }
 0x1a8   : > { %v674_v49 = vadd.f32 %v673_v47, %v2175_v37  ;;  %v778_v50 = vpack.c.bf16 %v672_v45, %v668_v46 }
 0x1a9   : > { %v677_v51 = vpop.f32.mrf.mxu0 }
 0x1aa   : > { %v1638_v52 = vpop.eup %1637  ;;  %v779_v53 = vpack.c.bf16 %v674_v49, %v670_v48  ;;  %v678_v58 = vadd.f32 %v677_v51, %v2173_v35 }
 0x1ab   : > { %v1640_v54 = vpop.eup %1639  ;;  %v679_v55 = vpop.f32.mrf.mxu0  ;;  %1029 = vmatprep.mubr.bf16.mxu1 %v1638_v52 }
 0x1ac   : > { %1645 = vtanh.bf16 %v779_v53  ;;  %1030 = vmatmul.mubr.bf16.gmra.mxu1 %v1640_v54  ;;  %v680_v60 = vadd.f32 %v679_v55, %v2175_v37 }
 0x1ad   : > { %1647 = vtanh.bf16 %v778_v50  ;;  %v681_v56 = vpop.f32.mrf.mxu0 }
 0x1ae   : > { %v682_v57 = vadd.f32 %v681_v56, %v2173_v35 }
 0x1af   : > { %v683_v59 = vpop.f32.mrf.mxu0 }
 0x1b0   : > { %v684_v61 = vadd.f32 %v683_v59, %v2175_v37  ;;  %v780_v62 = vpack.c.bf16 %v682_v57, %v678_v58 }
 0x1b1   : > { %v687_v63 = vpop.f32.mrf.mxu0 }
 0x1b2   : > { %v1642_v1 = vpop.eup %1641  ;;  %v781_v2 = vpack.c.bf16 %v684_v61, %v680_v60  ;;  %v688_v8 = vadd.f32 %v687_v63, %v2173_v35 }
 0x1b3   : > { %v1644_v3 = vpop.eup %1643  ;;  %v689_v5 = vpop.f32.mrf.mxu0  ;;  %1037 = vmatprep.mubr.bf16.mxu1 %v1642_v1 }
 0x1b4   : > { %1649 = vtanh.bf16 %v781_v2  ;;  %1038 = vmatmul.mubr.bf16.gmra.mxu1 %v1644_v3  ;;  %v690_v10 = vadd.f32 %v689_v5, %v2175_v37 }
 0x1b5   : > { %1651 = vtanh.bf16 %v780_v62  ;;  %v691_v6 = vpop.f32.mrf.mxu0 }
 0x1b6   : > { %v692_v7 = vadd.f32 %v691_v6, %v2173_v35 }
 0x1b7   : > { %v693_v9 = vpop.f32.mrf.mxu0 }
 0x1b8   : > { %v694_v11 = vadd.f32 %v693_v9, %v2175_v37  ;;  %v782_v12 = vpack.c.bf16 %v692_v7, %v688_v8 }
 0x1b9   : > { %v697_v13 = vpop.f32.mrf.mxu0 }
 0x1ba   : > { %v1646_v14 = vpop.eup %1645  ;;  %v783_v15 = vpack.c.bf16 %v694_v11, %v690_v10  ;;  %v698_v21 = vadd.f32 %v697_v13, %v2173_v35 }
 0x1bb   : > { %v1648_v16 = vpop.eup %1647  ;;  %v699_v17 = vpop.f32.mrf.mxu0  ;;  %1045 = vmatprep.mubr.bf16.mxu1 %v1646_v14 }
 0x1bc   : > { %1653 = vtanh.bf16 %v783_v15  ;;  %1046 = vmatmul.mubr.bf16.gmra.mxu1 %v1648_v16  ;;  %v700_v23 = vadd.f32 %v699_v17, %v2175_v37 }
 0x1bd   : > { %1655 = vtanh.bf16 %v782_v12  ;;  %v701_v18 = vpop.f32.mrf.mxu0 }
 0x1be   : > { %v702_v20 = vadd.f32 %v701_v18, %v2173_v35 }
 0x1bf   : > { %v703_v22 = vpop.f32.mrf.mxu0 }
 0x1c0   : > { %v704_v24 = vadd.f32 %v703_v22, %v2175_v37  ;;  %v784_v25 = vpack.c.bf16 %v702_v20, %v698_v21 }
 0x1c1   : > { %v707_v26 = vpop.f32.mrf.mxu0 }
 0x1c2   : > { %v1650_v28 = vpop.eup %1649  ;;  %v785_v29 = vpack.c.bf16 %v704_v24, %v700_v23  ;;  %v708_v34 = vadd.f32 %v707_v26, %v2173_v35 }
 0x1c3   : > { %v1652_v30 = vpop.eup %1651  ;;  %v709_v31 = vpop.f32.mrf.mxu0  ;;  %1053 = vmatprep.mubr.bf16.mxu1 %v1650_v28 }
 0x1c4   : > { %1657 = vtanh.bf16 %v785_v29  ;;  %1054 = vmatmul.mubr.bf16.gmra.mxu1 %v1652_v30  ;;  %v710_v0 = vadd.f32 %v709_v31, %v2175_v37 }
 0x1c5   : > { %1659 = vtanh.bf16 %v784_v25  ;;  %v711_v32 = vpop.f32.mrf.mxu0 }
 0x1c6   : > { %v712_v33 = vadd.f32 %v711_v32, %v2173_v35 }
 0x1c7   : > { %v713_v36 = vpop.f32.mrf.mxu0 }
 0x1c8   : > { %v714_v38 = vadd.f32 %v713_v36, %v2175_v37  ;;  %v786_v27 = vpack.c.bf16 %v712_v33, %v708_v34 }
 0x1c9   : > { %v717_v39 = vpop.f32.mrf.mxu0 }
 0x1ca   : > { %v1654_v40 = vpop.eup %1653  ;;  %v787_v41 = vpack.c.bf16 %v714_v38, %v710_v0  ;;  %v718_v46 = vadd.f32 %v717_v39, %v2173_v35 }
 0x1cb   : > { %v1656_v42 = vpop.eup %1655  ;;  %v719_v43 = vpop.f32.mrf.mxu0  ;;  %1061 = vmatprep.mubr.bf16.mxu1 %v1654_v40 }
 0x1cc   : > { %1661 = vtanh.bf16 %v787_v41  ;;  %1062 = vmatmul.mubr.bf16.gmra.mxu1 %v1656_v42  ;;  %v720_v48 = vadd.f32 %v719_v43, %v2175_v37 }
 0x1cd   : > { %1663 = vtanh.bf16 %v786_v27  ;;  %v721_v44 = vpop.f32.mrf.mxu0 }
 0x1ce   : > { %v722_v45 = vadd.f32 %v721_v44, %v2173_v35 }
 0x1cf   : > { %v723_v47 = vpop.f32.mrf.mxu0 }
 0x1d0   : > { %v724_v49 = vadd.f32 %v723_v47, %v2175_v37  ;;  %v788_v50 = vpack.c.bf16 %v722_v45, %v718_v46 }
 0x1d1   : > { %v727_v51 = vpop.f32.mrf.mxu0 }
 0x1d2   : > { %v1658_v52 = vpop.eup %1657  ;;  %v789_v53 = vpack.c.bf16 %v724_v49, %v720_v48  ;;  %v728_v58 = vadd.f32 %v727_v51, %v2173_v35 }
 0x1d3   : > { %v1660_v54 = vpop.eup %1659  ;;  %v729_v55 = vpop.f32.mrf.mxu0  ;;  %1069 = vmatprep.mubr.bf16.mxu1 %v1658_v52 }
 0x1d4   : > { %1665 = vtanh.bf16 %v789_v53  ;;  %1070 = vmatmul.mubr.bf16.gmra.mxu1 %v1660_v54  ;;  %v730_v60 = vadd.f32 %v729_v55, %v2175_v37 }
 0x1d5   : > { %1667 = vtanh.bf16 %v788_v50  ;;  %v731_v56 = vpop.f32.mrf.mxu0 }
 0x1d6   : > { %v732_v57 = vadd.f32 %v731_v56, %v2173_v35 }
 0x1d7   : > { %v733_v59 = vpop.f32.mrf.mxu0 }
 0x1d8   : > { %v734_v61 = vadd.f32 %v733_v59, %v2175_v37  ;;  %v790_v62 = vpack.c.bf16 %v732_v57, %v728_v58 }
 0x1d9   : > { %v737_v63 = vpop.f32.mrf.mxu0 }
 0x1da   : > { %v1662_v1 = vpop.eup %1661  ;;  %v791_v2 = vpack.c.bf16 %v734_v61, %v730_v60  ;;  %v738_v8 = vadd.f32 %v737_v63, %v2173_v35 }
 0x1db   : > { %v1664_v3 = vpop.eup %1663  ;;  %v739_v5 = vpop.f32.mrf.mxu0  ;;  %1077 = vmatprep.mubr.bf16.mxu1 %v1662_v1 }
 0x1dc   : > { %1669 = vtanh.bf16 %v791_v2  ;;  %1078 = vmatmul.mubr.bf16.gmra.mxu1 %v1664_v3  ;;  %v740_v10 = vadd.f32 %v739_v5, %v2175_v37 }
 0x1dd   : > { %1671 = vtanh.bf16 %v790_v62  ;;  %v741_v6 = vpop.f32.mrf.mxu0 }
 0x1de   : > { %v742_v7 = vadd.f32 %v741_v6, %v2173_v35 }
 0x1df   : > { %v743_v9 = vpop.f32.mrf.mxu0 }
 0x1e0   : > { %v744_v11 = vadd.f32 %v743_v9, %v2175_v37  ;;  %v792_v12 = vpack.c.bf16 %v742_v7, %v738_v8 }
 0x1e1   : > { %v747_v13 = vpop.f32.mrf.mxu0 }
 0x1e2   : > { %v1666_v14 = vpop.eup %1665  ;;  %v793_v15 = vpack.c.bf16 %v744_v11, %v740_v10  ;;  %v748_v21 = vadd.f32 %v747_v13, %v2173_v35 }
 0x1e3   : > { %v1668_v16 = vpop.eup %1667  ;;  %v749_v17 = vpop.f32.mrf.mxu0  ;;  %1085 = vmatprep.mubr.bf16.mxu1 %v1666_v14 }
 0x1e4   : > { %1673 = vtanh.bf16 %v793_v15  ;;  %1086 = vmatmul.mubr.bf16.gmra.mxu1 %v1668_v16  ;;  %v750_v23 = vadd.f32 %v749_v17, %v2175_v37 }
 0x1e5   : > { %1675 = vtanh.bf16 %v792_v12  ;;  %v751_v18 = vpop.f32.mrf.mxu0 }
 0x1e6   : > { %v752_v20 = vadd.f32 %v751_v18, %v2173_v35 }
 0x1e7   : > { %v753_v22 = vpop.f32.mrf.mxu0 }
 0x1e8   : > { %v754_v24 = vadd.f32 %v753_v22, %v2175_v37  ;;  %v794_v25 = vpack.c.bf16 %v752_v20, %v748_v21 }
 0x1e9   : > { %v757_v26 = vpop.f32.mrf.mxu0 }
 0x1ea   : > { %v1670_v28 = vpop.eup %1669  ;;  %v795_v29 = vpack.c.bf16 %v754_v24, %v750_v23  ;;  %v758_v34 = vadd.f32 %v757_v26, %v2173_v35 }
 0x1eb   : > { %v1672_v30 = vpop.eup %1671  ;;  %v759_v31 = vpop.f32.mrf.mxu0  ;;  %1093 = vmatprep.mubr.bf16.mxu1 %v1670_v28 }
 0x1ec   : > { %1677 = vtanh.bf16 %v795_v29  ;;  %1094 = vmatmul.mubr.bf16.gmra.mxu1 %v1672_v30  ;;  %v760_v0 = vadd.f32 %v759_v31, %v2175_v37 }
 0x1ed   : > { %1679 = vtanh.bf16 %v794_v25  ;;  %v761_v32 = vpop.f32.mrf.mxu0 }
 0x1ee   : > { %v762_v33 = vadd.f32 %v761_v32, %v2173_v35 }
 0x1ef   : > { %v763_v36 = vpop.f32.mrf.mxu0 }
 0x1f0   : > { %v764_v38 = vadd.f32 %v763_v36, %v2175_v37  ;;  %v796_v27 = vpack.c.bf16 %v762_v33, %v758_v34  ;;  %v2244_v37 = vld [vmem:[%s2446_s6] ss:$0 sm:$0xff] }
 0x1f2   : > { %v1674_v39 = vpop.eup %1673  ;;  %v797_v40 = vpack.c.bf16 %v764_v38, %v760_v0 }
 0x1f3   : > { %v1676_v41 = vpop.eup %1675  ;;  %1101 = vmatprep.mubr.bf16.mxu1 %v1674_v39 }
 0x1f4   : > { %1681 = vtanh.bf16 %v797_v40  ;;  %1102 = vmatmul.mubr.bf16.gmra.mxu1 %v1676_v41 }
 0x1f5   : > { %1683 = vtanh.bf16 %v796_v27 }
 0x1fa   : > { %v1678_v42 = vpop.eup %1677 }
 0x1fb   : > { %v1680_v43 = vpop.eup %1679  ;;  %1109 = vmatprep.mubr.bf16.mxu1 %v1678_v42 }
 0x1fc   : > { %1110 = vmatmul.mubr.bf16.gmra.mxu1 %v1680_v43 }
 0x202   : > { %v1682_v44 = vpop.eup %1681 }
 0x203   : > { %v1684_v45 = vpop.eup %1683  ;;  %1117 = vmatprep.mubr.bf16.mxu1 %v1682_v44 }
 0x204   : > { %1118 = vmatmul.mubr.bf16.gmra.mxu1 %v1684_v45 }
 0x24c   : > { %v1412_v35 = vpop.f32.mrf.mxu1 }
 0x24e   : > { %v1413_v46 = vpop.f32.mrf.mxu1 }
 0x24f   : > { %v1414_v47 = vadd.f32 %v1413_v46, %v1412_v35 }
 0x250   : > { %v1415_v48 = vpop.f32.mrf.mxu1 }
 0x251   : > { %v1000_v49 = vadd.f32 %v1414_v47, %v2244_v37 }
 0x252   : > { %v1416_v50 = vpop.f32.mrf.mxu1 }
 0x253   : > { %v1127_v51 = vmul.f32 %v1000_v49, %v2051_v4  ;;  %v1417_v52 = vadd.f32 %v1416_v50, %v1415_v48 }
 0x254   : > { %v1418_v53 = vpop.f32.mrf.mxu1 }
 0x255   : > { %v1159_v54 = vadd.f32 %v1127_v51, %v2055_v19  ;;  %v1003_v55 = vadd.f32 %v1417_v52, %v2244_v37 }
 0x256   : > { %v1419_v56 = vpop.f32.mrf.mxu1 }
 0x257   : > { %1191 = vst [vmem:[%s2252_s1] sm:$0xff] %v1159_v54  ;;  %v1128_v57 = vmul.f32 %v1003_v55, %v2051_v4  ;;  %v1420_v58 = vadd.f32 %v1419_v56, %v1418_v53 }
 0x258   : > { %v1421_v59 = vpop.f32.mrf.mxu1 }
 0x259   : > { %v1160_v60 = vadd.f32 %v1128_v57, %v2055_v19  ;;  %v1008_v61 = vadd.f32 %v1420_v58, %v2244_v37 }
 0x25a   : > { %v1422_v62 = vpop.f32.mrf.mxu1 }
 0x25b   : > { %1192 = vst [vmem:[%s2252_s1 + $0x8] sm:$0xff] %v1160_v60  ;;  %v1129_v63 = vmul.f32 %v1008_v61, %v2051_v4  ;;  %v1423_v1 = vadd.f32 %v1422_v62, %v1421_v59 }
 0x25c   : > { %v1424_v2 = vpop.f32.mrf.mxu1 }
 0x25d   : > { %v1161_v3 = vadd.f32 %v1129_v63, %v2055_v19  ;;  %v1011_v5 = vadd.f32 %v1423_v1, %v2244_v37 }
 0x25e   : > { %v1425_v6 = vpop.f32.mrf.mxu1 }
 0x25f   : > { %1193 = vst [vmem:[%s2252_s1 + $0x10] sm:$0xff] %v1161_v3  ;;  %v1130_v7 = vmul.f32 %v1011_v5, %v2051_v4  ;;  %v1426_v8 = vadd.f32 %v1425_v6, %v1424_v2 }
 0x260   : > { %v1427_v9 = vpop.f32.mrf.mxu1 }
 0x261   : > { %v1162_v10 = vadd.f32 %v1130_v7, %v2055_v19  ;;  %v1016_v11 = vadd.f32 %v1426_v8, %v2244_v37 }
 0x262   : > { %v1428_v12 = vpop.f32.mrf.mxu1 }
 0x263   : > { %1194 = vst [vmem:[%s2252_s1 + $0x18] sm:$0xff] %v1162_v10  ;;  %v1131_v13 = vmul.f32 %v1016_v11, %v2051_v4  ;;  %v1429_v14 = vadd.f32 %v1428_v12, %v1427_v9 }
 0x264   : > { %v1430_v15 = vpop.f32.mrf.mxu1 }
 0x265   : > { %v1163_v16 = vadd.f32 %v1131_v13, %v2055_v19  ;;  %v1019_v17 = vadd.f32 %v1429_v14, %v2244_v37 }
 0x266   : > { %v1431_v18 = vpop.f32.mrf.mxu1 }
 0x267   : > { %1195 = vst [vmem:[%s2252_s1 + $0x20] sm:$0xff] %v1163_v16  ;;  %v1132_v20 = vmul.f32 %v1019_v17, %v2051_v4  ;;  %v1432_v21 = vadd.f32 %v1431_v18, %v1430_v15 }
 0x268   : > { %v1433_v22 = vpop.f32.mrf.mxu1 }
 0x269   : > { %v1164_v23 = vadd.f32 %v1132_v20, %v2055_v19  ;;  %v1024_v24 = vadd.f32 %v1432_v21, %v2244_v37 }
 0x26a   : > { %v1434_v25 = vpop.f32.mrf.mxu1 }
 0x26b   : > { %1196 = vst [vmem:[%s2252_s1 + $0x28] sm:$0xff] %v1164_v23  ;;  %v1133_v26 = vmul.f32 %v1024_v24, %v2051_v4  ;;  %v1435_v28 = vadd.f32 %v1434_v25, %v1433_v22 }
 0x26c   : > { %v1436_v29 = vpop.f32.mrf.mxu1 }
 0x26d   : > { %v1165_v30 = vadd.f32 %v1133_v26, %v2055_v19  ;;  %v1027_v31 = vadd.f32 %v1435_v28, %v2244_v37 }
 0x26e   : > { %v1437_v32 = vpop.f32.mrf.mxu1 }
 0x26f   : > { %1197 = vst [vmem:[%s2252_s1 + $0x30] sm:$0xff] %v1165_v30  ;;  %v1134_v33 = vmul.f32 %v1027_v31, %v2051_v4  ;;  %v1438_v34 = vadd.f32 %v1437_v32, %v1436_v29 }
 0x270   : > { %v1439_v36 = vpop.f32.mrf.mxu1 }
 0x271   : > { %v1166_v0 = vadd.f32 %v1134_v33, %v2055_v19  ;;  %v1032_v38 = vadd.f32 %v1438_v34, %v2244_v37 }
 0x272   : > { %v1440_v27 = vpop.f32.mrf.mxu1 }
 0x273   : > { %1198 = vst [vmem:[%s2252_s1 + $0x38] sm:$0xff] %v1166_v0  ;;  %v1135_v39 = vmul.f32 %v1032_v38, %v2051_v4  ;;  %v1441_v40 = vadd.f32 %v1440_v27, %v1439_v36 }
 0x274   : > { %v1442_v41 = vpop.f32.mrf.mxu1 }
 0x275   : > { %v1167_v42 = vadd.f32 %v1135_v39, %v2055_v19  ;;  %v1035_v43 = vadd.f32 %v1441_v40, %v2244_v37 }
 0x276   : > { %v1443_v44 = vpop.f32.mrf.mxu1 }
 0x277   : > { %1199 = vst [vmem:[%s2252_s1 + $0x40] sm:$0xff] %v1167_v42  ;;  %v1136_v45 = vmul.f32 %v1035_v43, %v2051_v4  ;;  %v1444_v35 = vadd.f32 %v1443_v44, %v1442_v41 }
 0x278   : > { %v1445_v46 = vpop.f32.mrf.mxu1 }
 0x279   : > { %v1168_v47 = vadd.f32 %v1136_v45, %v2055_v19  ;;  %v1040_v48 = vadd.f32 %v1444_v35, %v2244_v37 }
 0x27a   : > { %v1446_v49 = vpop.f32.mrf.mxu1 }
 0x27b   : > { %1200 = vst [vmem:[%s2252_s1 + $0x48] sm:$0xff] %v1168_v47  ;;  %v1137_v50 = vmul.f32 %v1040_v48, %v2051_v4  ;;  %v1447_v51 = vadd.f32 %v1446_v49, %v1445_v46 }
 0x27c   : > { %v1448_v52 = vpop.f32.mrf.mxu1 }
 0x27d   : > { %v1169_v53 = vadd.f32 %v1137_v50, %v2055_v19  ;;  %v1043_v54 = vadd.f32 %v1447_v51, %v2244_v37 }
 0x27e   : > { %v1449_v55 = vpop.f32.mrf.mxu1 }
 0x27f   : > { %1201 = vst [vmem:[%s2252_s1 + $0x50] sm:$0xff] %v1169_v53  ;;  %v1138_v56 = vmul.f32 %v1043_v54, %v2051_v4  ;;  %v1450_v57 = vadd.f32 %v1449_v55, %v1448_v52 }
 0x280   : > { %v1451_v58 = vpop.f32.mrf.mxu1 }
 0x281   : > { %v1170_v59 = vadd.f32 %v1138_v56, %v2055_v19  ;;  %v1048_v60 = vadd.f32 %v1450_v57, %v2244_v37 }
 0x282   : > { %v1452_v61 = vpop.f32.mrf.mxu1 }
 0x283   : > { %1202 = vst [vmem:[%s2252_s1 + $0x58] sm:$0xff] %v1170_v59  ;;  %v1139_v62 = vmul.f32 %v1048_v60, %v2051_v4  ;;  %v1453_v63 = vadd.f32 %v1452_v61, %v1451_v58 }
 0x284   : > { %v1454_v1 = vpop.f32.mrf.mxu1 }
 0x285   : > { %v1171_v2 = vadd.f32 %v1139_v62, %v2055_v19  ;;  %v1051_v3 = vadd.f32 %v1453_v63, %v2244_v37 }
 0x286   : > { %v1455_v5 = vpop.f32.mrf.mxu1 }
 0x287   : > { %1203 = vst [vmem:[%s2252_s1 + $0x60] sm:$0xff] %v1171_v2  ;;  %v1140_v6 = vmul.f32 %v1051_v3, %v2051_v4  ;;  %v1456_v7 = vadd.f32 %v1455_v5, %v1454_v1 }
 0x288   : > { %v1457_v8 = vpop.f32.mrf.mxu1 }
 0x289   : > { %v1172_v9 = vadd.f32 %v1140_v6, %v2055_v19  ;;  %v1056_v10 = vadd.f32 %v1456_v7, %v2244_v37 }
 0x28a   : > { %v1458_v11 = vpop.f32.mrf.mxu1 }
 0x28b   : > { %1204 = vst [vmem:[%s2252_s1 + $0x68] sm:$0xff] %v1172_v9  ;;  %v1141_v12 = vmul.f32 %v1056_v10, %v2051_v4  ;;  %v1459_v13 = vadd.f32 %v1458_v11, %v1457_v8 }
 0x28c   : > { %v1460_v14 = vpop.f32.mrf.mxu1 }
 0x28d   : > { %v1173_v15 = vadd.f32 %v1141_v12, %v2055_v19  ;;  %v1059_v16 = vadd.f32 %v1459_v13, %v2244_v37 }
 0x28e   : > { %v1461_v17 = vpop.f32.mrf.mxu1 }
 0x28f   : > { %1205 = vst [vmem:[%s2252_s1 + $0x70] sm:$0xff] %v1173_v15  ;;  %v1142_v18 = vmul.f32 %v1059_v16, %v2051_v4  ;;  %v1462_v20 = vadd.f32 %v1461_v17, %v1460_v14 }
 0x290   : > { %v1463_v21 = vpop.f32.mrf.mxu1 }
 0x291   : > { %v1174_v22 = vadd.f32 %v1142_v18, %v2055_v19  ;;  %v1064_v23 = vadd.f32 %v1462_v20, %v2244_v37 }
 0x292   : > { %v1464_v24 = vpop.f32.mrf.mxu1 }
 0x293   : > { %1206 = vst [vmem:[%s2252_s1 + $0x78] sm:$0xff] %v1174_v22  ;;  %v1143_v25 = vmul.f32 %v1064_v23, %v2051_v4  ;;  %v1465_v26 = vadd.f32 %v1464_v24, %v1463_v21 }
 0x294   : > { %v1466_v28 = vpop.f32.mrf.mxu1 }
 0x295   : > { %v1175_v29 = vadd.f32 %v1143_v25, %v2055_v19  ;;  %v1067_v30 = vadd.f32 %v1465_v26, %v2244_v37 }
 0x296   : > { %v1467_v31 = vpop.f32.mrf.mxu1 }
 0x297   : > { %1207 = vst [vmem:[%s2252_s1 + $0x80] sm:$0xff] %v1175_v29  ;;  %v1144_v32 = vmul.f32 %v1067_v30, %v2051_v4  ;;  %v1468_v33 = vadd.f32 %v1467_v31, %v1466_v28 }
 0x298   : > { %v1469_v34 = vpop.f32.mrf.mxu1 }
 0x299   : > { %v1176_v36 = vadd.f32 %v1144_v32, %v2055_v19  ;;  %v1072_v0 = vadd.f32 %v1468_v33, %v2244_v37 }
 0x29a   : > { %v1470_v38 = vpop.f32.mrf.mxu1 }
 0x29b   : > { %1208 = vst [vmem:[%s2252_s1 + $0x88] sm:$0xff] %v1176_v36  ;;  %v1145_v27 = vmul.f32 %v1072_v0, %v2051_v4  ;;  %v1471_v39 = vadd.f32 %v1470_v38, %v1469_v34 }
 0x29c   : > { %v1472_v40 = vpop.f32.mrf.mxu1 }
 0x29d   : > { %v1177_v41 = vadd.f32 %v1145_v27, %v2055_v19  ;;  %v1075_v42 = vadd.f32 %v1471_v39, %v2244_v37 }
 0x29e   : > { %v1473_v43 = vpop.f32.mrf.mxu1 }
 0x29f   : > { %1209 = vst [vmem:[%s2252_s1 + $0x90] sm:$0xff] %v1177_v41  ;;  %v1146_v44 = vmul.f32 %v1075_v42, %v2051_v4  ;;  %v1474_v45 = vadd.f32 %v1473_v43, %v1472_v40 }
 0x2a0   : > { %v1475_v35 = vpop.f32.mrf.mxu1 }
 0x2a1   : > { %v1178_v46 = vadd.f32 %v1146_v44, %v2055_v19  ;;  %v1080_v47 = vadd.f32 %v1474_v45, %v2244_v37 }
 0x2a2   : > { %v1476_v48 = vpop.f32.mrf.mxu1 }
 0x2a3   : > { %1210 = vst [vmem:[%s2252_s1 + $0x98] sm:$0xff] %v1178_v46  ;;  %v1147_v49 = vmul.f32 %v1080_v47, %v2051_v4  ;;  %v1477_v50 = vadd.f32 %v1476_v48, %v1475_v35 }
 0x2a4   : > { %v1478_v51 = vpop.f32.mrf.mxu1 }
 0x2a5   : > { %v1179_v52 = vadd.f32 %v1147_v49, %v2055_v19  ;;  %v1083_v53 = vadd.f32 %v1477_v50, %v2244_v37 }
 0x2a6   : > { %v1479_v54 = vpop.f32.mrf.mxu1 }
 0x2a7   : > { %1211 = vst [vmem:[%s2252_s1 + $0xa0] sm:$0xff] %v1179_v52  ;;  %v1148_v55 = vmul.f32 %v1083_v53, %v2051_v4  ;;  %v1480_v56 = vadd.f32 %v1479_v54, %v1478_v51 }
 0x2a8   : > { %v1481_v57 = vpop.f32.mrf.mxu1 }
 0x2a9   : > { %v1180_v58 = vadd.f32 %v1148_v55, %v2055_v19  ;;  %v1088_v59 = vadd.f32 %v1480_v56, %v2244_v37 }
 0x2aa   : > { %v1482_v60 = vpop.f32.mrf.mxu1 }
 0x2ab   : > { %1212 = vst [vmem:[%s2252_s1 + $0xa8] sm:$0xff] %v1180_v58  ;;  %v1149_v61 = vmul.f32 %v1088_v59, %v2051_v4  ;;  %v1483_v62 = vadd.f32 %v1482_v60, %v1481_v57 }
 0x2ac   : > { %v1484_v63 = vpop.f32.mrf.mxu1 }
 0x2ad   : > { %v1181_v1 = vadd.f32 %v1149_v61, %v2055_v19  ;;  %v1091_v2 = vadd.f32 %v1483_v62, %v2244_v37 }
 0x2ae   : > { %v1485_v3 = vpop.f32.mrf.mxu1 }
 0x2af   : > { %1213 = vst [vmem:[%s2252_s1 + $0xb0] sm:$0xff] %v1181_v1  ;;  %v1150_v5 = vmul.f32 %v1091_v2, %v2051_v4  ;;  %v1486_v6 = vadd.f32 %v1485_v3, %v1484_v63 }
 0x2b0   : > { %v1487_v7 = vpop.f32.mrf.mxu1 }
 0x2b1   : > { %v1182_v8 = vadd.f32 %v1150_v5, %v2055_v19  ;;  %v1096_v9 = vadd.f32 %v1486_v6, %v2244_v37 }
 0x2b2   : > { %v1488_v10 = vpop.f32.mrf.mxu1 }
 0x2b3   : > { %1214 = vst [vmem:[%s2252_s1 + $0xb8] sm:$0xff] %v1182_v8  ;;  %v1151_v11 = vmul.f32 %v1096_v9, %v2051_v4  ;;  %v1489_v12 = vadd.f32 %v1488_v10, %v1487_v7 }
 0x2b4   : > { %v1490_v13 = vpop.f32.mrf.mxu1 }
 0x2b5   : > { %v1183_v14 = vadd.f32 %v1151_v11, %v2055_v19  ;;  %v1099_v15 = vadd.f32 %v1489_v12, %v2244_v37 }
 0x2b6   : > { %v1491_v16 = vpop.f32.mrf.mxu1 }
 0x2b7   : > { %1215 = vst [vmem:[%s2252_s1 + $0xc0] sm:$0xff] %v1183_v14  ;;  %v1152_v17 = vmul.f32 %v1099_v15, %v2051_v4  ;;  %v1492_v18 = vadd.f32 %v1491_v16, %v1490_v13 }
 0x2b8   : > { %v1493_v20 = vpop.f32.mrf.mxu1 }
 0x2b9   : > { %v1184_v21 = vadd.f32 %v1152_v17, %v2055_v19  ;;  %v1104_v22 = vadd.f32 %v1492_v18, %v2244_v37 }
 0x2ba   : > { %v1494_v23 = vpop.f32.mrf.mxu1 }
 0x2bb   : > { %1216 = vst [vmem:[%s2252_s1 + $0xc8] sm:$0xff] %v1184_v21  ;;  %v1153_v24 = vmul.f32 %v1104_v22, %v2051_v4  ;;  %v1495_v25 = vadd.f32 %v1494_v23, %v1493_v20 }
 0x2bc   : > { %v1496_v26 = vpop.f32.mrf.mxu1 }
 0x2bd   : > { %v1185_v28 = vadd.f32 %v1153_v24, %v2055_v19  ;;  %v1107_v29 = vadd.f32 %v1495_v25, %v2244_v37 }
 0x2be   : > { %v1497_v30 = vpop.f32.mrf.mxu1 }
 0x2bf   : > { %1217 = vst [vmem:[%s2252_s1 + $0xd0] sm:$0xff] %v1185_v28  ;;  %v1154_v31 = vmul.f32 %v1107_v29, %v2051_v4  ;;  %v1498_v32 = vadd.f32 %v1497_v30, %v1496_v26 }
 0x2c0   : > { %v1499_v33 = vpop.f32.mrf.mxu1 }
 0x2c1   : > { %v1186_v34 = vadd.f32 %v1154_v31, %v2055_v19  ;;  %v1112_v36 = vadd.f32 %v1498_v32, %v2244_v37 }
 0x2c2   : > { %v1500_v0 = vpop.f32.mrf.mxu1 }
 0x2c3   : > { %1218 = vst [vmem:[%s2252_s1 + $0xd8] sm:$0xff] %v1186_v34  ;;  %v1155_v38 = vmul.f32 %v1112_v36, %v2051_v4  ;;  %v1501_v27 = vadd.f32 %v1500_v0, %v1499_v33 }
 0x2c4   : > { %v1502_v39 = vpop.f32.mrf.mxu1 }
 0x2c5   : > { %v1187_v40 = vadd.f32 %v1155_v38, %v2055_v19  ;;  %v1115_v41 = vadd.f32 %v1501_v27, %v2244_v37 }
 0x2c6   : > { %v1503_v42 = vpop.f32.mrf.mxu1 }
 0x2c7   : > { %1219 = vst [vmem:[%s2252_s1 + $0xe0] sm:$0xff] %v1187_v40  ;;  %v1156_v43 = vmul.f32 %v1115_v41, %v2051_v4  ;;  %v1504_v44 = vadd.f32 %v1503_v42, %v1502_v39 }
 0x2c8   : > { %v1505_v45 = vpop.f32.mrf.mxu1 }
 0x2c9   : > { %v1188_v35 = vadd.f32 %v1156_v43, %v2055_v19  ;;  %v1120_v46 = vadd.f32 %v1504_v44, %v2244_v37 }
 0x2ca   : > { %v1506_v47 = vpop.f32.mrf.mxu1 }
 0x2cb   : > { %1220 = vst [vmem:[%s2252_s1 + $0xe8] sm:$0xff] %v1188_v35  ;;  %v1157_v48 = vmul.f32 %v1120_v46, %v2051_v4  ;;  %v1507_v49 = vadd.f32 %v1506_v47, %v1505_v45 }
 0x2cd   : > { %v1189_v50 = vadd.f32 %v1157_v48, %v2055_v19  ;;  %v1123_v51 = vadd.f32 %v1507_v49, %v2244_v37 }
 0x2cf   : > { %1221 = vst [vmem:[%s2252_s1 + $0xf0] sm:$0xff] %v1189_v50  ;;  %v1158_v52 = vmul.f32 %v1123_v51, %v2051_v4  ;;  %1230 = sbr.rel (!%p2459_p10) target bundleno = 751 (0x2ef), region = 64 }
 0x2d1   : > { %v1190_v53 = vadd.f32 %v1158_v52, %v2055_v19 }
 0x2d3   : > { %1222 = vst [vmem:[%s2252_s1 + $0xf8] sm:$0xff] %v1190_v53 }
 0x2d4   : > { %s2468_s19 = smov (!%p1233_p1, %s1232_s19), 32 }
 0x2d5   : > { %s2382_s24 = sshll.u32 %s2468_s19, 7 }
 0x2d6   : > { %s1237_s25 = ssub.s32 4096, %s2382_s24 }
 0x2d7   : > { %1238 = vsyncadd %s1224_s10, %s1237_s25  ;;  %p1388_p3 = scmp.ne.s32.totalorder %s2382_s24, 0  ;;  %s1395_s15 = sshll.u32 %s1913_s0, 12 }
 0x2d8   : > { %s2392_s20 = scalar_lea.hbm %s2447_s7, %s1395_s15  ;;  %s1243_s26 = sshll.u32 %s2252_s1, 4  ;;  %s2395_s26 = int_to_ptr.vmem [resolvable:$true] %s1243_s26 }
 0x2d9   : > { %s1763_s14 = scalar_lea.vmem %s2395_s26, %s2382_s24  ;;  %s1843_s11 = smov [#allocation10]  }
 0x2da   : > { %p1764_p7 = scmp.ne.s32.totalorder %s2395_s26, %s1763_s14  ;;  %s1767_s18 = sshll.u32 %s1843_s11, 4  ;;  %s1768_s18 = int_to_ptr.vmem [resolvable:$false] %s1767_s18 }
 0x2db   : > { %s1769_s0 = scalar_lea.vmem %s1768_s18, 8192  ;;  %p1770_p4 = scmp.lt.s32.totalorder %s2395_s26, %s1768_s18 }
 0x2dc   : > { %p1765_p9 = pnand %p1764_p7, %p1388_p3  ;;  %p1771_p6 = scmp.lt.s32.totalorder %s1769_s0, %s1763_s14 }
 0x2de   : > { %p1766_p12 = pneg %p1765_p9  ;;  %p1772_p11 = por %p1771_p6, %p1770_p4 }
 0x2e0   : > { %p1773_p0 = pnand %p1772_p11, %p1766_p12 }
 0x2e2   : > { %1776 = shalt.err (!%p1773_p0)
}
 0x2e3   : > { %s1777_s27 = scalar_lea.hbm %s2392_s20, %s2382_s24  ;;  %s1781_s21 = scalar_lea.hbm %s2447_s7, 8064 }
 0x2e4   : > { %p1778_p2 = scmp.ne.s32.totalorder %s2392_s20, %s1777_s27  ;;  %p1782_p10 = scmp.lt.s32.totalorder %s2392_s20, %s2447_s7 }
 0x2e5   : > { %p1783_p1 = scmp.lt.s32.totalorder %s1781_s21, %s1777_s27 }
 0x2e6   : > { %p1779_p5 = pnand %p1778_p2, %p1388_p3 }
 0x2e7   : > { %p1784_p7 = por %p1783_p1, %p1782_p10 }
 0x2e8   : > { %p1780_p13 = pneg %p1779_p5 }
 0x2ea   : > { %p1785_p9 = pnand %p1784_p7, %p1780_p13 }
 0x2ec   : > { %1788 = shalt.err (!%p1785_p9)
}
 0x2ed   : > { %s1844_s15 = smov 128   ;;  %s1845_s22 = smov 8  }
 0x2ee   : > { %1249 = dma.vmem_to_hbm [thread:$0]  (%p1388_p3), %s2395_s26, %s2382_s24, %s2392_s20, %s1224_s10, %s1844_s15, %s1844_s15, %s1845_s22  }
 0x2ef PF: > { %s1258_s17 = sand.u32 1, %s1819_s28   ;;  %p2460_p12 = scmp.ne.s32.totalorder %s2453_s16, 0 }
 0x2f0   : > { %s1259_s14 = scalar_lea.sflag [#allocation6], %s1258_s17 }
 0x2f1   : > { %p1528_p4 = pnand %p1339_p8, %p2460_p12 }
 0x2f3   : > { %p1529_p6 = pneg %p1528_p4 }
 0x2f5   : > { %1814 = dma.done.wait (%p1529_p6), %s1259_s14, 4096  }
 0x2f6   : > { %1816 = vsyncadd (%p1529_p6), %s1259_s14, 4294963200  ;;  %p23_p11 = scmp.ge.s32.totalorder %s1917_s9, 4   ;;  %s2461_s28 = smov %s1823_s29 }
 0x2f7   : > { %s2462_s29 = smov %s1827_s30  ;;  %s2463_s30 = smov %s1929_s12 }
 0x2f8   : > { %s2464_s8 = smov %s1917_s9  ;;  %25 = sbr.rel (!%p23_p11) target bundleno = 9 (0x9), region = 101 }
 0x2fd   :  { %1264 = vsyncpa [#allocation5], 1 }
 0x2fe   :  { %1266 = vsyncpa [#allocation5 + $0x1], 1 }
 0x2ff   :  { %1267 = vsyncpa [#allocation8], 1 }
 0x300   :  { %1268 = vsyncpa [#allocation6], 1 }
 0x301   :  { %1270 = vsyncpa [#allocation6 + $0x1], 1 }

</bundles_post_ra>
